<compile_context>
chip_gen: v7x
topology: tpu7x:2x2x1
jax: 0.10.0
libtpu: 0.0.40
codegen_flags: <defaults>
</compile_context>

<pallas_src>
import functools

import jax
import jax.numpy as jnp
from jax import lax
from jax.experimental import pallas as pl
from jax.experimental.pallas import tpu as pltpu

EPS = 1e-5  # nn.LayerNorm default


def _layer_norm(x, gamma, beta):
    mean = jnp.mean(x, axis=-1, keepdims=True)
    var = jnp.mean((x - mean) ** 2, axis=-1, keepdims=True)
    return (x - mean) * lax.rsqrt(var + EPS) * gamma + beta


def encoder_layer_kernel(num_heads, compute_dtype, tiled, *refs):
    if tiled:
        (xq_ref, xkv_ref,
         wqkv_ref, bqkv_ref, wo_ref, bo_ref,
         ln1_g_ref, ln1_b_ref,
         w1_ref, b1_ref, w2_ref, b2_ref,
         ln2_g_ref, ln2_b_ref,
         o_ref, k_scr, v_scr) = refs
    else:
        (xq_ref,
         wqkv_ref, bqkv_ref, wo_ref, bo_ref,
         ln1_g_ref, ln1_b_ref,
         w1_ref, b1_ref, w2_ref, b2_ref,
         ln2_g_ref, ln2_b_ref,
         o_ref) = refs
        xkv_ref = None
        k_scr = v_scr = None

    cdt = compute_dtype

    xq_f32 = xq_ref[0].astype(jnp.float32)          # (TQ, D) residual path in f32
    xq = xq_f32.astype(cdt)                         # matmul operand
    TQ, D = xq.shape
    H = num_heads
    Dh = D // H
    scale = Dh ** -0.5

    wqkv = wqkv_ref[...]                            # (D, 3D), compute dtype
    bqkv = bqkv_ref[...].astype(jnp.float32)        # (1, 3D)

    # Fused QKV projection for the query tile: one (TQ,D)@(D,3D) matmul.
    qkv_q = jnp.dot(xq, wqkv, preferred_element_type=jnp.float32) + bqkv
    q = qkv_q[:, :D] * scale                        # fairseq scales q after bias

    if not tiled:
        # Single query tile covers the whole sequence: reuse the fused projection.
        k = qkv_q[:, D:2 * D].astype(cdt)
        v = qkv_q[:, 2 * D:].astype(cdt)
    else:
        # K/V for the full sequence, projected once per (batch, sequence) and kept
        # resident in VMEM scratch across the query-tile grid axis.
        @pl.when(pl.program_id(1) == 0)
        def _project_kv():
            xkv = xkv_ref[0].astype(cdt)            # (S, D)
            kv = jnp.dot(xkv, wqkv[:, D:],
                         preferred_element_type=jnp.float32) + bqkv[:, D:]
            k_scr[...] = kv[:, :D].astype(k_scr.dtype)
            v_scr[...] = kv[:, D:].astype(v_scr.dtype)

        k = k_scr[...]
        v = v_scr[...]

    # Per-head attention.  Scores via dot_general (RHS consumed transposed by the
    # MXU, no explicit k.T); softmax in f32 with EUP reciprocal; per-head contexts
    # concatenated so out_proj is a single full-D contraction.
    ctx_heads = []
    for h in range(H):                              # static unroll; H is small
        lo = h * Dh
        qh = q[:, lo:lo + Dh].astype(cdt)
        kh = k[:, lo:lo + Dh].astype(cdt)
        vh = v[:, lo:lo + Dh].astype(cdt)
        s = lax.dot_general(qh, kh, (((1,), (1,)), ((), ())),
                            preferred_element_type=jnp.float32)      # (TQ, S)
        s = s - jnp.max(s, axis=-1, keepdims=True)
        p = jnp.exp(s)
        inv = pl.reciprocal(jnp.sum(p, axis=-1, keepdims=True), approx=True)
        p = (p * inv).astype(cdt)
        ctx_heads.append(jnp.dot(p, vh, preferred_element_type=jnp.float32))
    ctx = jnp.concatenate(ctx_heads, axis=-1).astype(cdt)             # (TQ, D)

    attn_out = (jnp.dot(ctx, wo_ref[...], preferred_element_type=jnp.float32)
                + bo_ref[...].astype(jnp.float32))

    # dropout(training=False) -> identity
    h1 = _layer_norm(xq_f32 + attn_out,
                     ln1_g_ref[...].astype(jnp.float32),
                     ln1_b_ref[...].astype(jnp.float32))

    # --- FFN ---
    f = jnp.dot(h1.astype(cdt), w1_ref[...], preferred_element_type=jnp.float32)
    f = jnp.maximum(f + b1_ref[...].astype(jnp.float32), 0.0)         # relu
    f = jnp.dot(f.astype(cdt), w2_ref[...], preferred_element_type=jnp.float32)
    f = f + b2_ref[...].astype(jnp.float32)

    out = _layer_norm(h1 + f,
                      ln2_g_ref[...].astype(jnp.float32),
                      ln2_b_ref[...].astype(jnp.float32))
    o_ref[0] = out.astype(o_ref.dtype)


def _pick_tq(S):
    for cand in (512, 256, 128):
        if S % cand == 0:
            return cand
    return S


def transformer_encoder_layer(x, params, num_heads, *,
                              compute_dtype=jnp.bfloat16, tq=None):
    """x: (B, S, D) float32.  Returns (y, attn=None) like the torch module."""
    B, S, D = x.shape
    F = params["w1"].shape[1]
    if tq is None:
        tq = _pick_tq(S)
    assert S % tq == 0, "sequence length must be divisible by the query tile"
    tiled = tq != S

    # Host-side weight fusion / dtype conversion.
    wqkv = jnp.concatenate([params["wq"], params["wk"], params["wv"]],
                           axis=1).astype(compute_dtype)              # (D, 3D)
    bqkv = jnp.concatenate([params["bq"], params["bk"], params["bv"]],
                           axis=1).astype(jnp.float32)                # (1, 3D)
    weights = [
        wqkv, bqkv,
        params["wo"].astype(compute_dtype), params["bo"].astype(jnp.float32),
        params["ln1_g"].astype(jnp.float32), params["ln1_b"].astype(jnp.float32),
        params["w1"].astype(compute_dtype), params["b1"].astype(jnp.float32),
        params["w2"].astype(compute_dtype), params["b2"].astype(jnp.float32),
        params["ln2_g"].astype(jnp.float32), params["ln2_b"].astype(jnp.float32),
    ]

    inputs = [x]
    in_specs = [pl.BlockSpec((1, tq, D), lambda b, qi: (b, qi, 0))]   # query tile
    if tiled:
        inputs.append(x)                                              # full-seq K/V source
        in_specs.append(pl.BlockSpec((1, S, D), lambda b, qi: (b, 0, 0)))
    for w in weights:
        # full (untiled) weight block, resident in VMEM for every grid step
        in_specs.append(pl.BlockSpec(w.shape, lambda b, qi, _nd=w.ndim: (0,) * _nd))
    inputs.extend(weights)

    scratch_shapes = []
    if tiled:
        scratch_shapes = [pltpu.VMEM((S, D), compute_dtype),          # K
                          pltpu.VMEM((S, D), compute_dtype)]          # V

    # VMEM budget: weights + blocks (x2 for double buffering) + scratch + intermediates.
    cbytes = jnp.dtype(compute_dtype).itemsize
    wbytes = sum(int(w.size) * int(w.dtype.itemsize) for w in weights)
    act = (tq * D + (S * D if tiled else 0) + tq * D) * 4
    scr = (2 * S * D * cbytes) if tiled else 0
    inter = (tq * 3 * D + S * 2 * D + tq * S + tq * F + tq * D) * 4
    est = 2 * (wbytes + act) + scr + inter

    vmem_cap = 64 * 1024 * 1024                     # conservative default (v7x)
    try:
        vmem_cap = int(pltpu.get_tpu_info().vmem_capacity_bytes)
    except Exception:
        pass
    vmem_limit = int(min(max(3 * est, 32 * 1024 * 1024),
                         max(vmem_cap - 16 * 1024 * 1024, 32 * 1024 * 1024)))

    flops = (2 * B * S * D * 3 * D          # QKV (K/V projected once per sequence)
             + 4 * B * S * S * D            # scores + context
             + 2 * B * S * D * D            # out_proj
             + 4 * B * S * D * F)           # FFN
    transcendentals = B * num_heads * S * S
    bytes_accessed = (3 if tiled else 2) * B * S * D * 4 + wbytes

    y = pl.pallas_call(
        functools.partial(encoder_layer_kernel, num_heads, compute_dtype, tiled),
        out_shape=jax.ShapeDtypeStruct((B, S, D), x.dtype),
        grid_spec=pltpu.PrefetchScalarGridSpec(
            num_scalar_prefetch=0,
            grid=(B, S // tq),
            in_specs=in_specs,
            out_specs=pl.BlockSpec((1, tq, D), lambda b, qi: (b, qi, 0)),
            scratch_shapes=scratch_shapes,
        ),
        compiler_params=pltpu.CompilerParams(
            # qi axis carries the K/V scratch -> "arbitrary"; batch stays "parallel"
            # for megacore sharding.
            dimension_semantics=("parallel", "arbitrary"),
            vmem_limit_bytes=vmem_limit,
        ),
        cost_estimate=pl.CostEstimate(
            flops=int(flops),
            transcendentals=int(transcendentals),
            bytes_accessed=int(bytes_accessed),
        ),
    )(*inputs)
    return y, None  # need_weights=False -> attn is None


# ---------------------------------------------------------------------------
# Pure-JAX reference (same math, no Pallas) for a correctness check.
# ---------------------------------------------------------------------------
def reference(x, p, num_heads):
    def one(xb):
        S, D = xb.shape
        Dh = D // num_heads
        scale = Dh ** -0.5
        q = (xb @ p["wq"] + p["bq"]) * scale
        k = xb @ p["wk"] + p["bk"]
        v = xb @ p["wv"] + p["bv"]
        qh = q.reshape(S, num_heads, Dh).transpose(1, 0, 2)
        kh = k.reshape(S, num_heads, Dh).transpose(1, 0, 2)
        vh = v.reshape(S, num_heads, Dh).transpose(1, 0, 2)
        s = jnp.einsum("hqd,hkd->hqk", qh, kh)
        pw = jax.nn.softmax(s, axis=-1)
        ctx = jnp.einsum("hqk,hkd->hqd", pw, vh).transpose(1, 0, 2).reshape(S, D)
        attn_out = ctx @ p["wo"] + p["bo"]
        h1 = _layer_norm(xb + attn_out, p["ln1_g"], p["ln1_b"])
        f = jax.nn.relu(h1 @ p["w1"] + p["b1"])
        f = f @ p["w2"] + p["b2"]
        return _layer_norm(h1 + f, p["ln2_g"], p["ln2_b"])

    return jax.vmap(one)(x)


def make_params(key, embed_dim, ffn_dim):
    ks = jax.random.split(key, 12)
    n = lambda k, s: (jax.random.normal(k, s, jnp.float32) * 0.02)
    return {
        # projection weights stored as (in, out) so kernel does x @ W directly
        "wq": n(ks[0], (embed_dim, embed_dim)),
        "bq": n(ks[1], (1, embed_dim)),
        "wk": n(ks[2], (embed_dim, embed_dim)),
        "bk": n(ks[3], (1, embed_dim)),
        "wv": n(ks[4], (embed_dim, embed_dim)),
        "bv": n(ks[5], (1, embed_dim)),
        "wo": n(ks[6], (embed_dim, embed_dim)),
        "bo": n(ks[7], (1, embed_dim)),
        "ln1_g": jnp.ones((1, embed_dim), jnp.float32),
        "ln1_b": jnp.zeros((1, embed_dim), jnp.float32),
        "w1": n(ks[8], (embed_dim, ffn_dim)),
        "b1": n(ks[9], (1, ffn_dim)),
        "w2": n(ks[10], (ffn_dim, embed_dim)),
        "b2": n(ks[11], (1, embed_dim)),
        "ln2_g": jnp.ones((1, embed_dim), jnp.float32),
        "ln2_b": jnp.zeros((1, embed_dim), jnp.float32),
    }


if __name__ == "__main__":
    B, S, D, H, FFN = 2, 8, 32, 4, 64

    key = jax.random.PRNGKey(0)
    kx, kp, kx2 = jax.random.split(key, 3)
    x = jax.random.normal(kx, (B, S, D), jnp.float32)
    params = make_params(kp, D, FFN)
    y_ref = reference(x, params, H)

    # 1) f32 matmul operands: tight check against the reference (single-tile path).
    y32, attn = transformer_encoder_layer(x, params, H, compute_dtype=jnp.float32)
    y32 = jax.block_until_ready(y32)
    assert y32.shape == (B, S, D) and attn is None
    err32 = jnp.max(jnp.abs(y32 - y_ref))
    assert jnp.allclose(y32, y_ref, atol=2e-3, rtol=2e-3), f"f32 max abs err = {err32}"

    # 2) bf16 matmul operands (the perf configuration): looser tolerance.
    y16, _ = transformer_encoder_layer(x, params, H, compute_dtype=jnp.bfloat16)
    y16 = jax.block_until_ready(y16)
    err16 = jnp.max(jnp.abs(y16 - y_ref))
    assert jnp.allclose(y16, y_ref, atol=5e-2, rtol=5e-2), f"bf16 max abs err = {err16}"

    # 3) exercise the sequence-tiled path (K/V projected once into VMEM scratch,
    #    query tiles stream over the "arbitrary" grid axis).
    S2 = 16
    x2 = jax.random.normal(kx2, (B, S2, D), jnp.float32)
    yt, _ = transformer_encoder_layer(x2, params, H, compute_dtype=jnp.bfloat16, tq=8)
    yt = jax.block_until_ready(yt)
    yt_ref = reference(x2, params, H)
    errt = jnp.max(jnp.abs(yt - yt_ref))
    assert jnp.allclose(yt, yt_ref, atol=5e-2, rtol=5e-2), f"tiled bf16 max abs err = {errt}"

    print("KERNEL_OK")
</pallas_src>

<mosaic_0001>
module attributes {stable_mosaic.version = 11 : i64} {
  func.func @encoder_layer_kernel(%arg0: i32, %arg1: i32, %arg2: memref<1x8x32xf32, #tpu.memory_space<vmem>>, %arg3: memref<32x96xf32, #tpu.memory_space<vmem>>, %arg4: memref<1x96xf32, #tpu.memory_space<vmem>>, %arg5: memref<32x32xf32, #tpu.memory_space<vmem>>, %arg6: memref<1x32xf32, #tpu.memory_space<vmem>>, %arg7: memref<1x32xf32, #tpu.memory_space<vmem>>, %arg8: memref<1x32xf32, #tpu.memory_space<vmem>>, %arg9: memref<32x64xf32, #tpu.memory_space<vmem>>, %arg10: memref<1x64xf32, #tpu.memory_space<vmem>>, %arg11: memref<64x32xf32, #tpu.memory_space<vmem>>, %arg12: memref<1x32xf32, #tpu.memory_space<vmem>>, %arg13: memref<1x32xf32, #tpu.memory_space<vmem>>, %arg14: memref<1x32xf32, #tpu.memory_space<vmem>>, %arg15: memref<1x8x32xf32, #tpu.memory_space<vmem>>) attributes {dimension_semantics = [#tpu.dimension_semantics<parallel>, #tpu.dimension_semantics<arbitrary>], iteration_bounds = array<i64: 2, 1>, scalar_prefetch = 0 : i64, scratch_operands = 0 : i64, tpu.core_type = #tpu.core_type<tc>, window_params = [{transform_indices = @transform_0, window_bounds = array<i64: 1, 8, 32>}, {pipeline_mode = #tpu.pipeline_mode<synchronous>, transform_indices = @transform_1, window_bounds = array<i64: 32, 96>}, {pipeline_mode = #tpu.pipeline_mode<synchronous>, transform_indices = @transform_2, window_bounds = array<i64: 1, 96>}, {pipeline_mode = #tpu.pipeline_mode<synchronous>, transform_indices = @transform_3, window_bounds = array<i64: 32, 32>}, {pipeline_mode = #tpu.pipeline_mode<synchronous>, transform_indices = @transform_4, window_bounds = array<i64: 1, 32>}, {pipeline_mode = #tpu.pipeline_mode<synchronous>, transform_indices = @transform_5, window_bounds = array<i64: 1, 32>}, {pipeline_mode = #tpu.pipeline_mode<synchronous>, transform_indices = @transform_6, window_bounds = array<i64: 1, 32>}, {pipeline_mode = #tpu.pipeline_mode<synchronous>, transform_indices = @transform_7, window_bounds = array<i64: 32, 64>}, {pipeline_mode = #tpu.pipeline_mode<synchronous>, transform_indices = @transform_8, window_bounds = array<i64: 1, 64>}, {pipeline_mode = #tpu.pipeline_mode<synchronous>, transform_indices = @transform_9, window_bounds = array<i64: 64, 32>}, {pipeline_mode = #tpu.pipeline_mode<synchronous>, transform_indices = @transform_10, window_bounds = array<i64: 1, 32>}, {pipeline_mode = #tpu.pipeline_mode<synchronous>, transform_indices = @transform_11, window_bounds = array<i64: 1, 32>}, {pipeline_mode = #tpu.pipeline_mode<synchronous>, transform_indices = @transform_12, window_bounds = array<i64: 1, 32>}, {transform_indices = @transform_13, window_bounds = array<i64: 1, 8, 32>}]} {
    %c0 = arith.constant 0 : index
    %c0_0 = arith.constant 0 : index
    %c0_1 = arith.constant 0 : index
    %0 = vector.load %arg2[%c0, %c0_0, %c0_1] : memref<1x8x32xf32, #tpu.memory_space<vmem>>, vector<1x8x32xf32>
    %1 = vector.shape_cast %0 : vector<1x8x32xf32> to vector<8x32xf32>
    %c0_2 = arith.constant 0 : index
    %c0_3 = arith.constant 0 : index
    %2 = vector.load %arg3[%c0_2, %c0_3] : memref<32x96xf32, #tpu.memory_space<vmem>>, vector<32x96xf32>
    %c0_4 = arith.constant 0 : index
    %c0_5 = arith.constant 0 : index
    %3 = vector.load %arg4[%c0_4, %c0_5] : memref<1x96xf32, #tpu.memory_space<vmem>>, vector<1x96xf32>
    %cst = arith.constant dense<0.000000e+00> : vector<8x96xf32>
    %4 = tpu.matmul %1, %2, %cst {dimension_numbers = #tpu.dot_dimension_numbers<[1], [0], [0], [1], [0, 0, 1, 1], [], []>} : vector<8x32xf32>, vector<32x96xf32>, vector<8x96xf32> -> vector<8x96xf32>
    %5 = vector.broadcast %3 : vector<1x96xf32> to vector<8x96xf32>
    %6 = arith.addf %4, %5 : vector<8x96xf32>
    %7 = vector.extract_strided_slice %6 {offsets = [0, 0], sizes = [8, 32], strides = [1, 1]} : vector<8x96xf32> to vector<8x32xf32>
    %cst_6 = arith.constant 0.353553385 : f32
    %8 = vector.broadcast %cst_6 : f32 to vector<8x32xf32>
    %9 = arith.mulf %7, %8 : vector<8x32xf32>
    %10 = vector.extract_strided_slice %6 {offsets = [0, 32], sizes = [8, 32], strides = [1, 1]} : vector<8x96xf32> to vector<8x32xf32>
    %11 = vector.extract_strided_slice %6 {offsets = [0, 64], sizes = [8, 32], strides = [1, 1]} : vector<8x96xf32> to vector<8x32xf32>
    %12 = vector.extract_strided_slice %9 {offsets = [0, 0], sizes = [8, 8], strides = [1, 1]} : vector<8x32xf32> to vector<8x8xf32>
    %13 = vector.extract_strided_slice %10 {offsets = [0, 0], sizes = [8, 8], strides = [1, 1]} : vector<8x32xf32> to vector<8x8xf32>
    %14 = vector.extract_strided_slice %11 {offsets = [0, 0], sizes = [8, 8], strides = [1, 1]} : vector<8x32xf32> to vector<8x8xf32>
    %cst_7 = arith.constant dense<0.000000e+00> : vector<8x8xf32>
    %15 = tpu.matmul %12, %13, %cst_7 {dimension_numbers = #tpu.dot_dimension_numbers<[1], [1], [0], [0], [0, 0, 1, 0], [], []>} : vector<8x8xf32>, vector<8x8xf32>, vector<8x8xf32> -> vector<8x8xf32>
    %cst_8 = arith.constant dense<0xFF800000> : vector<8xf32>
    %16 = vector.multi_reduction <maximumf>, %15, %cst_8 [1] : vector<8x8xf32> to vector<8xf32>
    %17 = vector.shape_cast %16 : vector<8xf32> to vector<8x1xf32>
    %18 = vector.broadcast %17 : vector<8x1xf32> to vector<8x8xf32>
    %19 = arith.subf %15, %18 : vector<8x8xf32>
    %20 = math.exp %19 : vector<8x8xf32>
    %cst_9 = arith.constant dense<0.000000e+00> : vector<8xf32>
    %21 = vector.multi_reduction <add>, %20, %cst_9 [1] : vector<8x8xf32> to vector<8xf32>
    %22 = vector.shape_cast %21 : vector<8xf32> to vector<8x1xf32>
    %23 = tpu.reciprocal %22 {approx = true} : vector<8x1xf32> -> vector<8x1xf32>
    %24 = vector.broadcast %23 : vector<8x1xf32> to vector<8x8xf32>
    %25 = arith.mulf %20, %24 : vector<8x8xf32>
    %cst_10 = arith.constant dense<0.000000e+00> : vector<8x8xf32>
    %26 = tpu.matmul %25, %14, %cst_10 {dimension_numbers = #tpu.dot_dimension_numbers<[1], [0], [0], [1], [0, 0, 1, 1], [], []>} : vector<8x8xf32>, vector<8x8xf32>, vector<8x8xf32> -> vector<8x8xf32>
    %27 = vector.extract_strided_slice %9 {offsets = [0, 8], sizes = [8, 8], strides = [1, 1]} : vector<8x32xf32> to vector<8x8xf32>
    %28 = vector.extract_strided_slice %10 {offsets = [0, 8], sizes = [8, 8], strides = [1, 1]} : vector<8x32xf32> to vector<8x8xf32>
    %29 = vector.extract_strided_slice %11 {offsets = [0, 8], sizes = [8, 8], strides = [1, 1]} : vector<8x32xf32> to vector<8x8xf32>
    %cst_11 = arith.constant dense<0.000000e+00> : vector<8x8xf32>
    %30 = tpu.matmul %27, %28, %cst_11 {dimension_numbers = #tpu.dot_dimension_numbers<[1], [1], [0], [0], [0, 0, 1, 0], [], []>} : vector<8x8xf32>, vector<8x8xf32>, vector<8x8xf32> -> vector<8x8xf32>
    %cst_12 = arith.constant dense<0xFF800000> : vector<8xf32>
    %31 = vector.multi_reduction <maximumf>, %30, %cst_12 [1] : vector<8x8xf32> to vector<8xf32>
    %32 = vector.shape_cast %31 : vector<8xf32> to vector<8x1xf32>
    %33 = vector.broadcast %32 : vector<8x1xf32> to vector<8x8xf32>
    %34 = arith.subf %30, %33 : vector<8x8xf32>
    %35 = math.exp %34 : vector<8x8xf32>
    %cst_13 = arith.constant dense<0.000000e+00> : vector<8xf32>
    %36 = vector.multi_reduction <add>, %35, %cst_13 [1] : vector<8x8xf32> to vector<8xf32>
    %37 = vector.shape_cast %36 : vector<8xf32> to vector<8x1xf32>
    %38 = tpu.reciprocal %37 {approx = true} : vector<8x1xf32> -> vector<8x1xf32>
    %39 = vector.broadcast %38 : vector<8x1xf32> to vector<8x8xf32>
    %40 = arith.mulf %35, %39 : vector<8x8xf32>
    %cst_14 = arith.constant dense<0.000000e+00> : vector<8x8xf32>
    %41 = tpu.matmul %40, %29, %cst_14 {dimension_numbers = #tpu.dot_dimension_numbers<[1], [0], [0], [1], [0, 0, 1, 1], [], []>} : vector<8x8xf32>, vector<8x8xf32>, vector<8x8xf32> -> vector<8x8xf32>
    %42 = vector.extract_strided_slice %9 {offsets = [0, 16], sizes = [8, 8], strides = [1, 1]} : vector<8x32xf32> to vector<8x8xf32>
    %43 = vector.extract_strided_slice %10 {offsets = [0, 16], sizes = [8, 8], strides = [1, 1]} : vector<8x32xf32> to vector<8x8xf32>
    %44 = vector.extract_strided_slice %11 {offsets = [0, 16], sizes = [8, 8], strides = [1, 1]} : vector<8x32xf32> to vector<8x8xf32>
    %cst_15 = arith.constant dense<0.000000e+00> : vector<8x8xf32>
    %45 = tpu.matmul %42, %43, %cst_15 {dimension_numbers = #tpu.dot_dimension_numbers<[1], [1], [0], [0], [0, 0, 1, 0], [], []>} : vector<8x8xf32>, vector<8x8xf32>, vector<8x8xf32> -> vector<8x8xf32>
    %cst_16 = arith.constant dense<0xFF800000> : vector<8xf32>
    %46 = vector.multi_reduction <maximumf>, %45, %cst_16 [1] : vector<8x8xf32> to vector<8xf32>
    %47 = vector.shape_cast %46 : vector<8xf32> to vector<8x1xf32>
    %48 = vector.broadcast %47 : vector<8x1xf32> to vector<8x8xf32>
    %49 = arith.subf %45, %48 : vector<8x8xf32>
    %50 = math.exp %49 : vector<8x8xf32>
    %cst_17 = arith.constant dense<0.000000e+00> : vector<8xf32>
    %51 = vector.multi_reduction <add>, %50, %cst_17 [1] : vector<8x8xf32> to vector<8xf32>
    %52 = vector.shape_cast %51 : vector<8xf32> to vector<8x1xf32>
    %53 = tpu.reciprocal %52 {approx = true} : vector<8x1xf32> -> vector<8x1xf32>
    %54 = vector.broadcast %53 : vector<8x1xf32> to vector<8x8xf32>
    %55 = arith.mulf %50, %54 : vector<8x8xf32>
    %cst_18 = arith.constant dense<0.000000e+00> : vector<8x8xf32>
    %56 = tpu.matmul %55, %44, %cst_18 {dimension_numbers = #tpu.dot_dimension_numbers<[1], [0], [0], [1], [0, 0, 1, 1], [], []>} : vector<8x8xf32>, vector<8x8xf32>, vector<8x8xf32> -> vector<8x8xf32>
    %57 = vector.extract_strided_slice %9 {offsets = [0, 24], sizes = [8, 8], strides = [1, 1]} : vector<8x32xf32> to vector<8x8xf32>
    %58 = vector.extract_strided_slice %10 {offsets = [0, 24], sizes = [8, 8], strides = [1, 1]} : vector<8x32xf32> to vector<8x8xf32>
    %59 = vector.extract_strided_slice %11 {offsets = [0, 24], sizes = [8, 8], strides = [1, 1]} : vector<8x32xf32> to vector<8x8xf32>
    %cst_19 = arith.constant dense<0.000000e+00> : vector<8x8xf32>
    %60 = tpu.matmul %57, %58, %cst_19 {dimension_numbers = #tpu.dot_dimension_numbers<[1], [1], [0], [0], [0, 0, 1, 0], [], []>} : vector<8x8xf32>, vector<8x8xf32>, vector<8x8xf32> -> vector<8x8xf32>
    %cst_20 = arith.constant dense<0xFF800000> : vector<8xf32>
    %61 = vector.multi_reduction <maximumf>, %60, %cst_20 [1] : vector<8x8xf32> to vector<8xf32>
    %62 = vector.shape_cast %61 : vector<8xf32> to vector<8x1xf32>
    %63 = vector.broadcast %62 : vector<8x1xf32> to vector<8x8xf32>
    %64 = arith.subf %60, %63 : vector<8x8xf32>
    %65 = math.exp %64 : vector<8x8xf32>
    %cst_21 = arith.constant dense<0.000000e+00> : vector<8xf32>
    %66 = vector.multi_reduction <add>, %65, %cst_21 [1] : vector<8x8xf32> to vector<8xf32>
    %67 = vector.shape_cast %66 : vector<8xf32> to vector<8x1xf32>
    %68 = tpu.reciprocal %67 {approx = true} : vector<8x1xf32> -> vector<8x1xf32>
    %69 = vector.broadcast %68 : vector<8x1xf32> to vector<8x8xf32>
    %70 = arith.mulf %65, %69 : vector<8x8xf32>
    %cst_22 = arith.constant dense<0.000000e+00> : vector<8x8xf32>
    %71 = tpu.matmul %70, %59, %cst_22 {dimension_numbers = #tpu.dot_dimension_numbers<[1], [0], [0], [1], [0, 0, 1, 1], [], []>} : vector<8x8xf32>, vector<8x8xf32>, vector<8x8xf32> -> vector<8x8xf32>
    %72 = tpu.concatenate %26, %41, %56, %71 in 1 : vector<8x8xf32>, vector<8x8xf32>, vector<8x8xf32>, vector<8x8xf32> -> vector<8x32xf32>
    %c0_23 = arith.constant 0 : index
    %c0_24 = arith.constant 0 : index
    %73 = vector.load %arg5[%c0_23, %c0_24] : memref<32x32xf32, #tpu.memory_space<vmem>>, vector<32x32xf32>
    %cst_25 = arith.constant dense<0.000000e+00> : vector<8x32xf32>
    %74 = tpu.matmul %72, %73, %cst_25 {dimension_numbers = #tpu.dot_dimension_numbers<[1], [0], [0], [1], [0, 0, 1, 1], [], []>} : vector<8x32xf32>, vector<32x32xf32>, vector<8x32xf32> -> vector<8x32xf32>
    %c0_26 = arith.constant 0 : index
    %c0_27 = arith.constant 0 : index
    %75 = vector.load %arg6[%c0_26, %c0_27] : memref<1x32xf32, #tpu.memory_space<vmem>>, vector<1x32xf32>
    %76 = vector.broadcast %75 : vector<1x32xf32> to vector<8x32xf32>
    %77 = arith.addf %74, %76 : vector<8x32xf32>
    %78 = arith.addf %1, %77 : vector<8x32xf32>
    %c0_28 = arith.constant 0 : index
    %c0_29 = arith.constant 0 : index
    %79 = vector.load %arg7[%c0_28, %c0_29] : memref<1x32xf32, #tpu.memory_space<vmem>>, vector<1x32xf32>
    %c0_30 = arith.constant 0 : index
    %c0_31 = arith.constant 0 : index
    %80 = vector.load %arg8[%c0_30, %c0_31] : memref<1x32xf32, #tpu.memory_space<vmem>>, vector<1x32xf32>
    %cst_32 = arith.constant dense<0.000000e+00> : vector<8xf32>
    %81 = vector.multi_reduction <add>, %78, %cst_32 [1] : vector<8x32xf32> to vector<8xf32>
    %82 = vector.shape_cast %81 : vector<8xf32> to vector<8x1xf32>
    %cst_33 = arith.constant 3.200000e+01 : f32
    %83 = vector.broadcast %cst_33 : f32 to vector<8x1xf32>
    %84 = arith.divf %82, %83 : vector<8x1xf32>
    %85 = vector.broadcast %84 : vector<8x1xf32> to vector<8x32xf32>
    %86 = arith.subf %78, %85 : vector<8x32xf32>
    %87 = arith.mulf %86, %86 : vector<8x32xf32>
    %cst_34 = arith.constant dense<0.000000e+00> : vector<8xf32>
    %88 = vector.multi_reduction <add>, %87, %cst_34 [1] : vector<8x32xf32> to vector<8xf32>
    %89 = vector.shape_cast %88 : vector<8xf32> to vector<8x1xf32>
    %cst_35 = arith.constant 3.200000e+01 : f32
    %90 = vector.broadcast %cst_35 : f32 to vector<8x1xf32>
    %91 = arith.divf %89, %90 : vector<8x1xf32>
    %92 = vector.broadcast %84 : vector<8x1xf32> to vector<8x32xf32>
    %93 = arith.subf %78, %92 : vector<8x32xf32>
    %cst_36 = arith.constant 9.99999974E-6 : f32
    %94 = vector.broadcast %cst_36 : f32 to vector<8x1xf32>
    %95 = arith.addf %91, %94 : vector<8x1xf32>
    %96 = math.rsqrt %95 : vector<8x1xf32>
    %97 = vector.broadcast %96 : vector<8x1xf32> to vector<8x32xf32>
    %98 = arith.mulf %93, %97 : vector<8x32xf32>
    %99 = vector.broadcast %79 : vector<1x32xf32> to vector<8x32xf32>
    %100 = arith.mulf %98, %99 : vector<8x32xf32>
    %101 = vector.broadcast %80 : vector<1x32xf32> to vector<8x32xf32>
    %102 = arith.addf %100, %101 : vector<8x32xf32>
    %c0_37 = arith.constant 0 : index
    %c0_38 = arith.constant 0 : index
    %103 = vector.load %arg9[%c0_37, %c0_38] : memref<32x64xf32, #tpu.memory_space<vmem>>, vector<32x64xf32>
    %cst_39 = arith.constant dense<0.000000e+00> : vector<8x64xf32>
    %104 = tpu.matmul %102, %103, %cst_39 {dimension_numbers = #tpu.dot_dimension_numbers<[1], [0], [0], [1], [0, 0, 1, 1], [], []>} : vector<8x32xf32>, vector<32x64xf32>, vector<8x64xf32> -> vector<8x64xf32>
    %c0_40 = arith.constant 0 : index
    %c0_41 = arith.constant 0 : index
    %105 = vector.load %arg10[%c0_40, %c0_41] : memref<1x64xf32, #tpu.memory_space<vmem>>, vector<1x64xf32>
    %106 = vector.broadcast %105 : vector<1x64xf32> to vector<8x64xf32>
    %107 = arith.addf %104, %106 : vector<8x64xf32>
    %cst_42 = arith.constant 0.000000e+00 : f32
    %108 = vector.broadcast %cst_42 : f32 to vector<8x64xf32>
    %109 = arith.maximumf %107, %108 : vector<8x64xf32>
    %c0_43 = arith.constant 0 : index
    %c0_44 = arith.constant 0 : index
    %110 = vector.load %arg11[%c0_43, %c0_44] : memref<64x32xf32, #tpu.memory_space<vmem>>, vector<64x32xf32>
    %cst_45 = arith.constant dense<0.000000e+00> : vector<8x32xf32>
    %111 = tpu.matmul %109, %110, %cst_45 {dimension_numbers = #tpu.dot_dimension_numbers<[1], [0], [0], [1], [0, 0, 1, 1], [], []>} : vector<8x64xf32>, vector<64x32xf32>, vector<8x32xf32> -> vector<8x32xf32>
    %c0_46 = arith.constant 0 : index
    %c0_47 = arith.constant 0 : index
    %112 = vector.load %arg12[%c0_46, %c0_47] : memref<1x32xf32, #tpu.memory_space<vmem>>, vector<1x32xf32>
    %113 = vector.broadcast %112 : vector<1x32xf32> to vector<8x32xf32>
    %114 = arith.addf %111, %113 : vector<8x32xf32>
    %115 = arith.addf %102, %114 : vector<8x32xf32>
    %c0_48 = arith.constant 0 : index
    %c0_49 = arith.constant 0 : index
    %116 = vector.load %arg13[%c0_48, %c0_49] : memref<1x32xf32, #tpu.memory_space<vmem>>, vector<1x32xf32>
    %c0_50 = arith.constant 0 : index
    %c0_51 = arith.constant 0 : index
    %117 = vector.load %arg14[%c0_50, %c0_51] : memref<1x32xf32, #tpu.memory_space<vmem>>, vector<1x32xf32>
    %cst_52 = arith.constant dense<0.000000e+00> : vector<8xf32>
    %118 = vector.multi_reduction <add>, %115, %cst_52 [1] : vector<8x32xf32> to vector<8xf32>
    %119 = vector.shape_cast %118 : vector<8xf32> to vector<8x1xf32>
    %cst_53 = arith.constant 3.200000e+01 : f32
    %120 = vector.broadcast %cst_53 : f32 to vector<8x1xf32>
    %121 = arith.divf %119, %120 : vector<8x1xf32>
    %122 = vector.broadcast %121 : vector<8x1xf32> to vector<8x32xf32>
    %123 = arith.subf %115, %122 : vector<8x32xf32>
    %124 = arith.mulf %123, %123 : vector<8x32xf32>
    %cst_54 = arith.constant dense<0.000000e+00> : vector<8xf32>
    %125 = vector.multi_reduction <add>, %124, %cst_54 [1] : vector<8x32xf32> to vector<8xf32>
    %126 = vector.shape_cast %125 : vector<8xf32> to vector<8x1xf32>
    %cst_55 = arith.constant 3.200000e+01 : f32
    %127 = vector.broadcast %cst_55 : f32 to vector<8x1xf32>
    %128 = arith.divf %126, %127 : vector<8x1xf32>
    %129 = vector.broadcast %121 : vector<8x1xf32> to vector<8x32xf32>
    %130 = arith.subf %115, %129 : vector<8x32xf32>
    %cst_56 = arith.constant 9.99999974E-6 : f32
    %131 = vector.broadcast %cst_56 : f32 to vector<8x1xf32>
    %132 = arith.addf %128, %131 : vector<8x1xf32>
    %133 = math.rsqrt %132 : vector<8x1xf32>
    %134 = vector.broadcast %133 : vector<8x1xf32> to vector<8x32xf32>
    %135 = arith.mulf %130, %134 : vector<8x32xf32>
    %136 = vector.broadcast %116 : vector<1x32xf32> to vector<8x32xf32>
    %137 = arith.mulf %135, %136 : vector<8x32xf32>
    %138 = vector.broadcast %117 : vector<1x32xf32> to vector<8x32xf32>
    %139 = arith.addf %137, %138 : vector<8x32xf32>
    %c0_57 = arith.constant 0 : index
    %c0_58 = arith.constant 0 : index
    %c0_59 = arith.constant 0 : index
    %140 = vector.load %arg15[%c0_57, %c0_58, %c0_59] : memref<1x8x32xf32, #tpu.memory_space<vmem>>, vector<1x8x32xf32>
    %141 = vector.shape_cast %140 : vector<1x8x32xf32> to vector<8x32xf32>
    %142 = vector.shape_cast %139 : vector<8x32xf32> to vector<1x8x32xf32>
    tpu.vector_store %arg15[%c0_57, %c0_58, %c0_59], %142 {strides = array<i32>} : memref<1x8x32xf32, #tpu.memory_space<vmem>>, vector<1x8x32xf32>,
    return
  }
  func.func @transform_0(%arg0: i32, %arg1: i32) -> (i32, i32, i32) {
    %c0_i32 = arith.constant 0 : i32
    %c0_i32_0 = arith.constant 0 : i32
    return %arg0, %arg1, %c0_i32 : i32, i32, i32
  }
  func.func @transform_1(%arg0: i32, %arg1: i32) -> (i32, i32) {
    %c0_i32 = arith.constant 0 : i32
    %c0_i32_0 = arith.constant 0 : i32
    %c0_i32_1 = arith.constant 0 : i32
    return %c0_i32, %c0_i32_0 : i32, i32
  }
  func.func @transform_2(%arg0: i32, %arg1: i32) -> (i32, i32) {
    %c0_i32 = arith.constant 0 : i32
    %c0_i32_0 = arith.constant 0 : i32
    %c0_i32_1 = arith.constant 0 : i32
    return %c0_i32, %c0_i32_0 : i32, i32
  }
  func.func @transform_3(%arg0: i32, %arg1: i32) -> (i32, i32) {
    %c0_i32 = arith.constant 0 : i32
    %c0_i32_0 = arith.constant 0 : i32
    %c0_i32_1 = arith.constant 0 : i32
    return %c0_i32, %c0_i32_0 : i32, i32
  }
  func.func @transform_4(%arg0: i32, %arg1: i32) -> (i32, i32) {
    %c0_i32 = arith.constant 0 : i32
    %c0_i32_0 = arith.constant 0 : i32
    %c0_i32_1 = arith.constant 0 : i32
    return %c0_i32, %c0_i32_0 : i32, i32
  }
  func.func @transform_5(%arg0: i32, %arg1: i32) -> (i32, i32) {
    %c0_i32 = arith.constant 0 : i32
    %c0_i32_0 = arith.constant 0 : i32
    %c0_i32_1 = arith.constant 0 : i32
    return %c0_i32, %c0_i32_0 : i32, i32
  }
  func.func @transform_6(%arg0: i32, %arg1: i32) -> (i32, i32) {
    %c0_i32 = arith.constant 0 : i32
    %c0_i32_0 = arith.constant 0 : i32
    %c0_i32_1 = arith.constant 0 : i32
    return %c0_i32, %c0_i32_0 : i32, i32
  }
  func.func @transform_7(%arg0: i32, %arg1: i32) -> (i32, i32) {
    %c0_i32 = arith.constant 0 : i32
    %c0_i32_0 = arith.constant 0 : i32
    %c0_i32_1 = arith.constant 0 : i32
    return %c0_i32, %c0_i32_0 : i32, i32
  }
  func.func @transform_8(%arg0: i32, %arg1: i32) -> (i32, i32) {
    %c0_i32 = arith.constant 0 : i32
    %c0_i32_0 = arith.constant 0 : i32
    %c0_i32_1 = arith.constant 0 : i32
    return %c0_i32, %c0_i32_0 : i32, i32
  }
  func.func @transform_9(%arg0: i32, %arg1: i32) -> (i32, i32) {
    %c0_i32 = arith.constant 0 : i32
    %c0_i32_0 = arith.constant 0 : i32
    %c0_i32_1 = arith.constant 0 : i32
    return %c0_i32, %c0_i32_0 : i32, i32
  }
  func.func @transform_10(%arg0: i32, %arg1: i32) -> (i32, i32) {
    %c0_i32 = arith.constant 0 : i32
    %c0_i32_0 = arith.constant 0 : i32
    %c0_i32_1 = arith.constant 0 : i32
    return %c0_i32, %c0_i32_0 : i32, i32
  }
  func.func @transform_11(%arg0: i32, %arg1: i32) -> (i32, i32) {
    %c0_i32 = arith.constant 0 : i32
    %c0_i32_0 = arith.constant 0 : i32
    %c0_i32_1 = arith.constant 0 : i32
    return %c0_i32, %c0_i32_0 : i32, i32
  }
  func.func @transform_12(%arg0: i32, %arg1: i32) -> (i32, i32) {
    %c0_i32 = arith.constant 0 : i32
    %c0_i32_0 = arith.constant 0 : i32
    %c0_i32_1 = arith.constant 0 : i32
    return %c0_i32, %c0_i32_0 : i32, i32
  }
  func.func @transform_13(%arg0: i32, %arg1: i32) -> (i32, i32, i32) {
    %c0_i32 = arith.constant 0 : i32
    %c0_i32_0 = arith.constant 0 : i32
    return %arg0, %arg1, %c0_i32 : i32, i32, i32
  }
}

</mosaic_0001>

<bundles_post_ra>
// kernel: tpu_custom_call.1
= control target key start
LH: loop header
LB: loop body
LE: loop exit
PB: predicated region body
PF: predicated region fallthrough
CT: control target
= control target key end

     0   :  { %s2792_s0 = inlined_call_operand.hbm [shape: f32[2,8,32], index: 0, kind: input, shape index: {}]   ;;  %s2793_s1 = inlined_call_operand.vmem [shape: f32[32,96], index: 1, kind: input, shape index: {}]   ;;  %s2794_s2 = inlined_call_operand.vmem [shape: f32[1,96], index: 2, kind: input, shape index: {}]   ;;  %s2795_s3 = inlined_call_operand.vmem [shape: f32[32,32], index: 3, kind: input, shape index: {}]   ;;  %s2796_s4 = inlined_call_operand.vmem [shape: f32[1,32], index: 4, kind: input, shape index: {}]   ;;  %s2797_s5 = inlined_call_operand.hbm [shape: f32[1,32], index: 5, kind: input, shape index: {}]   ;;  %s2798_s6 = inlined_call_operand.hbm [shape: f32[1,32], index: 6, kind: input, shape index: {}]   ;;  %s2799_s7 = inlined_call_operand.vmem [shape: f32[32,64], index: 7, kind: input, shape index: {}]   ;;  %s2800_s8 = inlined_call_operand.hbm [shape: f32[1,64], index: 8, kind: input, shape index: {}]   ;;  %s2801_s9 = inlined_call_operand.vmem [shape: f32[64,32], index: 9, kind: input, shape index: {}]   ;;  %s2802_s10 = inlined_call_operand.vmem [shape: f32[1,32], index: 10, kind: input, shape index: {}]   ;;  %s2803_s11 = inlined_call_operand.vmem [shape: f32[1,32], index: 11, kind: input, shape index: {}]   ;;  %s2804_s12 = inlined_call_operand.vmem [shape: f32[1,32], index: 12, kind: input, shape index: {}]   ;;  %s2805_s13 = inlined_call_operand.hbm [shape: f32[2,8,32], index: 13, kind: output, shape index: {}]  }
   0x1   :  { %2814 = sst [smem:[#allocation18_spill]] %s2792_s0 }
   0x2   :  { %2815 = sst [smem:[#allocation19_spill]] %s2793_s1 }
   0x3   :  { %2816 = sst [smem:[#allocation20_spill]] %s2801_s9 }
   0x4   :  { %2817 = sst [smem:[#allocation21_spill]] %s2802_s10 }
   0x5   :  { %2818 = sst [smem:[#allocation22_spill]] %s2803_s11 }
   0x6   :  { %2819 = sst [smem:[#allocation23_spill]] %s2804_s12 }
   0x7   :  { %2820 = sst [smem:[#allocation24_spill]] %s2805_s13 }
   0x8   :  { %18 = vsyncpa [#allocation3], 0 }
   0x9   :  { %20 = vsyncpa [#allocation3 + $0x1], 0 }
   0xa   :  { %21 = vsyncpa [#allocation6], 0 }
   0xb   :  { %22 = vsyncpa [#allocation9], 0 }
   0xc   :  { %23 = vsyncpa [#allocation4], 0 }
   0xd   :  { %25 = vsyncpa [#allocation4 + $0x1], 0  ;;  %s2353_s25 = smov 0   ;;  %s2355_s26 = smov 0  }
   0xe   :  { %s2357_s27 = smov 0   ;;  %s2359_s28 = smov 0  }
   0xf   :  { %s2361_s29 = smov 0   ;;  %s2363_s30 = smov 0  }
  0x10 LB: > { %2821 = sst [smem:[#allocation15_spill]] %s2239_s25  ;;  %s1720_s14 = sadd.s32 4294967295, %s2259_s30   ;;  %s2259_s30 = sphi %s2363_s30, %s31_s30   ;;  %s2255_s29 = sphi %s2361_s29, %s2854_s29   ;;  %s2251_s28 = sphi %s2359_s28, %s2853_s28   ;;  %s2247_s27 = sphi %s2357_s27, %s2852_s27   ;;  %s2243_s26 = sphi %s2355_s26, %s2851_s26   ;;  %s2239_s25 = sphi %s2353_s25, %s2850_s25  }
  0x11   : > { %2822 = sst [smem:[#allocation16_spill]] %s2251_s28  ;;  %s1721_s15 = sadd.s32 4294967294, %s2259_s30  }
  0x12   : > { %p65_p0 = scmp.ne.s32.totalorder %s2243_s26, %s2239_s25  ;;  %p2387_p1 = scmp.eq.s32.totalorder %s1720_s14, 0 }
  0x13   : > { %p2391_p2 = scmp.eq.s32.totalorder %s1720_s14, 1  ;;  %p349_p3 = scmp.eq.s32.totalorder %s1721_s15, 1 }
  0x14   : > { %s2823_s16 = scalar_select %p2387_p1, 1, 0 }
  0x15   : > { %s2824_s17 = scalar_select %p2391_p2, 1, 0 }
  0x16   : > { %p2397_p4 = por %p2387_p1, %p65_p0  ;;  %p1722_p5 = scmp.ge.s32.totalorder %s2259_s30, 1 }
  0x17   : > { %p2402_p6 = por %p349_p3, %p65_p0  ;;  %p356_p7 = scmp.lt.s32.totalorder %s2259_s30, 3 }
  0x18   : > { %s2825_s18 = scalar_select %p2397_p4, 1, 0 }
  0x19   : > { %s2826_s19 = scalar_select %p2402_p6, 1, 0 }
  0x1a   : > { %p2407_p8 = pnand %p1722_p5, %p356_p7  ;;  %s2261_s21 = smov [#allocation5]  }
  0x1b   : > { %2827 = sst [smem:[#allocation17_spill]] %s2826_s19  ;;  %s381_s22 = sshll.u32 %s2261_s21, 4  ;;  %s382_s22 = int_to_ptr.vmem [resolvable:$true] %s381_s22 }
  0x1c   : > { %s2828_s20 = scalar_select %p2407_p8, 1, 0 }
  0x1d   : > { %p1941_p10 = pneg %p2407_p8  ;;  %s2262_s23 = smov [#allocation7]  }
  0x1e   : > { %s392_s24 = sshll.u32 %s2262_s23, 4  ;;  %s2263_s15 = smov [#allocation8]   ;;  %s2420_s24 = int_to_ptr.vmem [resolvable:$true] %s392_s24 }
  0x1f   : > { %p2416_p11 = pnand %p1941_p10, %p2387_p1  ;;  %s406_s19 = sshll.u32 %s2263_s15, 4  ;;  %s2422_s19 = int_to_ptr.vmem [resolvable:$true] %s406_s19 }
  0x20   : > { %s2055_s13 = scalar_lea.hbm %s2797_s5, 16 }
  0x21   : > { %p2056_p12 = scmp.ne.s32.totalorder %s2797_s5, %s2055_s13  ;;  %p2432_p13 = pneg %p2416_p11 }
  0x22   : > { %p2062_p5 = scmp.lt.u32.totalorder %s2055_s13, %s2797_s5 }
  0x23   : > { %p2058_p0 = pnand %p2432_p13, %p2056_p12 }
  0x25   : > { %p2059_p3 = pneg %p2058_p0 }
  0x27   : > { %p2064_p7 = pnand %p2062_p5, %p2059_p3 }
  0x29   : > { %2067 = shalt.err (!%p2064_p7)
}
  0x2a   : > { %s2068_s25 = scalar_lea.vmem %s382_s22, 16  ;;  %s2075_s11 = scalar_lea.vmem %s382_s22, 32 }
  0x2b   : > { %p2069_p10 = scmp.ne.s32.totalorder %s382_s22, %s2068_s25  ;;  %p2076_p1 = scmp.lt.s32.totalorder %s382_s22, %s382_s22 }
  0x2c   : > { %p2077_p4 = scmp.lt.s32.totalorder %s2075_s11, %s2068_s25 }
  0x2d   : > { %p2071_p9 = pnand %p2069_p10, %p2432_p13 }
  0x2e   : > { %p2078_p8 = por %p2077_p4, %p2076_p1 }
  0x2f   : > { %p2072_p6 = pneg %p2071_p9 }
  0x31   : > { %p2079_p2 = pnand %p2078_p8, %p2072_p6 }
  0x33   : > { %2082 = shalt.err (!%p2079_p2)
}
  0x34   : > { %1944 = dma.hbm_to_vmem [thread:$0]  (!%p2416_p11), %s2797_s5, 16, %s382_s22, [#allocation6]  }
  0x35   : > { %s2083_s15 = scalar_lea.hbm %s2798_s6, 16 }
  0x36   : > { %p2084_p9 = scmp.ne.s32.totalorder %s2798_s6, %s2083_s15  ;;  %p2090_p2 = scmp.lt.u32.totalorder %s2083_s15, %s2798_s6 }
  0x38   : > { %p2086_p12 = pnand %p2084_p9, %p2432_p13 }
  0x3a   : > { %p2087_p1 = pneg %p2086_p12 }
  0x3c   : > { %p2092_p4 = pnand %p2090_p2, %p2087_p1 }
  0x3e   : > { %2095 = shalt.err (!%p2092_p4)
}
  0x3f   : > { %s2096_s22 = scalar_lea.vmem %s2420_s24, 16  ;;  %s2103_s9 = scalar_lea.vmem %s2420_s24, 32 }
  0x40   : > { %p2097_p6 = scmp.ne.s32.totalorder %s2420_s24, %s2096_s22  ;;  %p2104_p3 = scmp.lt.s32.totalorder %s2420_s24, %s2420_s24 }
  0x41   : > { %p2105_p5 = scmp.lt.s32.totalorder %s2103_s9, %s2096_s22 }
  0x42   : > { %p2099_p8 = pnand %p2097_p6, %p2432_p13 }
  0x43   : > { %p2106_p7 = por %p2105_p5, %p2104_p3 }
  0x44   : > { %p2100_p0 = pneg %p2099_p8 }
  0x46   : > { %p2107_p10 = pnand %p2106_p7, %p2100_p0 }
  0x48   : > { %2110 = shalt.err (!%p2107_p10)
}
  0x49   : > { %1947 = dma.hbm_to_vmem [thread:$0]  (!%p2416_p11), %s2798_s6, 16, %s2420_s24, [#allocation6]  }
  0x4a   : > { %s2111_s28 = scalar_lea.hbm %s2800_s8, 16 }
  0x4b   : > { %p2112_p9 = scmp.ne.s32.totalorder %s2800_s8, %s2111_s28  ;;  %p2118_p2 = scmp.lt.u32.totalorder %s2111_s28, %s2800_s8 }
  0x4d   : > { %p2114_p12 = pnand %p2112_p9, %p2432_p13 }
  0x4f   : > { %p2115_p1 = pneg %p2114_p12 }
  0x51   : > { %p2120_p4 = pnand %p2118_p2, %p2115_p1 }
  0x53   : > { %2123 = shalt.err (!%p2120_p4)
}
  0x54   : > { %s2124_s24 = scalar_lea.vmem %s2422_s19, 16  ;;  %s2131_s9 = scalar_lea.vmem %s2422_s19, 32 }
  0x55   : > { %p2125_p6 = scmp.ne.s32.totalorder %s2422_s19, %s2124_s24  ;;  %p2132_p3 = scmp.lt.s32.totalorder %s2422_s19, %s2422_s19 }
  0x56   : > { %p2133_p5 = scmp.lt.s32.totalorder %s2131_s9, %s2124_s24 }
  0x57   : > { %p2127_p8 = pnand %p2125_p6, %p2432_p13 }
  0x58   : > { %p2134_p7 = por %p2133_p5, %p2132_p3 }
  0x59   : > { %p2128_p0 = pneg %p2127_p8 }
  0x5b   : > { %p2135_p10 = pnand %p2134_p7, %p2128_p0 }
  0x5d   : > { %2138 = shalt.err (!%p2135_p10)
}
  0x5e   : > { %1950 = dma.hbm_to_vmem [thread:$0]  (!%p2416_p11), %s2800_s8, 16, %s2422_s19, [#allocation9]  }
  0x5f   : > { %s52_s23 = sadd.s32 1, %s2247_s27  ;;  %s43_s21 = sadd.s32 1, %s2255_s29 }
  0x60   : > { %p59_p13 = scmp.ne.s32.totalorder %s2247_s27, %s2243_s26  ;;  %p45_p9 = scmp.ge.s32.totalorder %s43_s21, 2 }
  0x61   : > { %p60_p12 = scmp.eq.s32.totalorder %s2259_s30, 0  ;;  %p2831_p1 = scmp.ne.s32.totalorder %s2824_s17, 0 }
  0x62   : > { %p1962_p4 = scmp.lt.s32.totalorder %s2259_s30, 2  ;;  %s2856_s21 = smov (%p45_p9, %s43_s21), 0 }
  0x63   : > { %p2503_p2 = por %p2831_p1, %p59_p13  ;;  %p61_p6 = por %p60_p12, %p59_p13 }
  0x64   : > { %s429_s13 = sand.u32 1, %s2247_s27   ;;  %s47_s28 = ssub.s32 %s2255_s29, %s2856_s21 }
  0x65   : > { %p50_p8 = scmp.eq.s32.totalorder %s47_s28, 0  ;;  %s1727_s19 = sshll.u32 %s429_s13, 3 }
  0x66   : > { %s1728_s15 = sshll.u32 %s2255_s29, 7  ;;  %s2833_s0 = sld [smem:[#allocation18_spill]] }
  0x67   : > { %s2515_s25 = scalar_select %p50_p8, %s2247_s27, %s52_s23  }
  0x68   : > { %s433_s24 = scalar_lea.vmem [#allocation2], %s1727_s19  ;;  %p2526_p11 = pnand %p1962_p4, %p61_p6 }
  0x69   : > { %s441_s9 = sshll.u32 %s433_s24, 4  ;;  %s430_s12 = scalar_lea.sflag [#allocation3], %s429_s13  ;;  %s2522_s9 = int_to_ptr.vmem [resolvable:$true] %s441_s9 }
  0x6a   : > { %p2141_p3 = pneg %p2526_p11 }
  0x6c   : > { %s2520_s17 = scalar_lea.hbm %s2833_s0, %s1728_s15  ;;  %s2144_s15 = scalar_lea.hbm %s2833_s0, 256 }
  0x6d   : > { %s2139_s23 = scalar_lea.hbm %s2520_s17, 128  ;;  %p2145_p10 = scmp.lt.u32.totalorder %s2520_s17, %s2833_s0 }
  0x6e   : > { %p2140_p0 = scmp.ne.s32.totalorder %s2520_s17, %s2139_s23  ;;  %p2146_p13 = scmp.lt.u32.totalorder %s2144_s15, %s2139_s23 }
  0x6f   : > { %p2148_p12 = scmp.lt.u32.totalorder %s2139_s23, %s2520_s17 }
  0x70   : > { %p2142_p5 = pnand %p2141_p3, %p2140_p0  ;;  %p2147_p9 = por %p2146_p13, %p2145_p10 }
  0x72   : > { %p2143_p7 = pneg %p2142_p5  ;;  %p2149_p1 = por %p2148_p12, %p2147_p9 }
  0x74   : > { %p2150_p4 = pnand %p2149_p1, %p2143_p7 }
  0x76   : > { %2153 = shalt.err (!%p2150_p4)
}
  0x77   : > { %s2154_s13 = scalar_lea.vmem %s2522_s9, 128  ;;  %s2264_s24 = smov [#allocation2]  }
  0x78   : > { %p2155_p6 = scmp.ne.s32.totalorder %s2522_s9, %s2154_s13  ;;  %s2159_s28 = sshll.u32 %s2264_s24, 4  ;;  %s2160_s28 = int_to_ptr.vmem [resolvable:$false] %s2159_s28 }
  0x79   : > { %s2161_s19 = scalar_lea.vmem %s2160_s28, 256  ;;  %p2162_p5 = scmp.lt.s32.totalorder %s2522_s9, %s2160_s28 }
  0x7a   : > { %p2157_p8 = pnand %p2155_p6, %p2141_p3  ;;  %p2163_p10 = scmp.lt.s32.totalorder %s2161_s19, %s2154_s13 }
  0x7c   : > { %p2158_p0 = pneg %p2157_p8  ;;  %p2164_p13 = por %p2163_p10, %p2162_p5 }
  0x7e   : > { %p2165_p9 = pnand %p2164_p13, %p2158_p0 }
  0x80   : > { %2168 = shalt.err (!%p2165_p9)
}
  0x81   : > { %1954 = dma.hbm_to_vmem [thread:$0]  (!%p2526_p11), %s2520_s17, 128, %s2522_s9, %s430_s12  }
  0x82   : > { %p2835_p7 = scmp.ne.s32.totalorder %s2828_s20, 0 }
  0x83   : > { %s2558_s23 = sand.u32 (!%p2835_p7), 1, %s2243_s26   ;;  %p2836_p3 = scmp.ne.s32.totalorder (!%p2835_p7), %s2825_s18, 0 }
  0x84   : > { %450 = sbr.rel (%p2835_p7) target bundleno = 2692 (0xa84), region = 72  ;;  %s1730_s15 = sshll.u32 (!%p2835_p7), %s2558_s23, 3 }
  0x85   : > { %s453_s11 = scalar_lea.sflag (!%p2835_p7), [#allocation3], %s2558_s23  ;;  %s456_s22 = scalar_lea.vmem (!%p2835_p7), [#allocation2], %s1730_s15 }
  0x8b   : > { %2222 = dma.done.wait (%p2836_p3), %s453_s11, 128  }
  0x8c   : > { %2224 = vsyncadd (%p2836_p3), %s453_s11, 4294967168  ;;  %p2837_p11 = scmp.ne.s32.totalorder %s2823_s16, 0 }
  0x8e   : > { %2226 = dma.done.wait (%p2837_p11), [#allocation6], 32  }
  0x8f   : > { %2228 = vsyncadd (%p2837_p11), [#allocation6], 4294967264 }
  0x90   : > { %2230 = dma.done.wait (%p2837_p11), [#allocation9], 16  }
  0x91   : > { %2232 = vsyncadd (%p2837_p11), [#allocation9], 4294967280  ;;  %v2265_v0 = vmov 0.0|0.0   ;;  %vm2266_vm0 = vmmov 0   ;;  %v2267_v1 = vmov 0.0   ;;  %s2838_s1 = sld [smem:[#allocation19_spill]] }
  0x92   : > { %1895 = vmatprep.subr.bf16.mxu1 %v2265_v0  ;;  %1811 = vmatprep.mubr.msk.f32.mxu1 %vm2266_vm0, %v2267_v1  ;;  %v2595_v8 = vld [vmem:[%s456_s22] sm:$0xff]  ;;  %vm523_vm1 = vcmask 261120   ;;  %s2268_s19 = smov 96   ;;  %s2269_s11 = smov 120   ;;  %vm601_vm2 = vcmask 64512   ;;  %vm1272_vm3 = vcmask 130048  }
  0x93   : > { %1824 = vmatprep.subr.mxu0 %v2267_v1  ;;  %1826 = vmatprep.mubr.msk.f32.mxu0 %vm2266_vm0, %v2267_v1  ;;  %v1735_v9 = vld [vmem:[%s2794_s2] ss:$0 sm:$0xff]  ;;  %s2270_s22 = smov 88   ;;  %s2271_s18 = smov 80   ;;  %vm1274_vm4 = vcmask 195584   ;;  %vm1491_vm5 = vcmask 523264  }
  0x94   : > { %s2272_s20 = smov 112   ;;  %s2273_s17 = smov 72  }
  0x95   : > { %s2274_s16 = smov 104   ;;  %s2275_s9 = smov 56  }
  0x96   : > { %s2276_s10 = smov 64   ;;  %s2277_s12 = smov 48  }
  0x97   : > { %v512_v2 = vld [vmem:[%s2838_s1] sm:$0xff]  ;;  %v513_v3 = vld [vmem:[%s2838_s1 + $0x8] sm:$0xff]  ;;  %v514_v4 = vld [vmem:[%s2838_s1 + $0x10] sm:$0xff]  ;;  %s2278_s13 = smov 40   ;;  %s2844_s0 = sld [smem:[#allocation24_spill]] }
  0x98   : > { %v1896_v5 = vpack.c.bf16 %v513_v3, %v512_v2  ;;  %v515_v6 = vld [vmem:[%s2838_s1 + $0x18] sm:$0xff] }
  0x99   : > { %v1899_v7 = vpack.c.bf16 %v515_v6, %v514_v4 }
  0x9a   : > { %1897 = vmatpush3.bf16.msra.mxu1 %v1896_v5 }
  0x9b   : > { %1898 = vmatprep.subr.bf16.mxu1 %v2265_v0 }
  0x9e   : > { %1900 = vmatpush3.bf16.msra.mxu1 %v1899_v7  ;;  %v1276_v7 = vld [vmem:[%s2795_s3] sm:$0xff] }
  0x9f   : > { %1814 = vmatprep.subr.mxu1 %v2267_v1 }
  0xa1   : > { %1812 = vmatmul.mubr.msk.f32.vlgmr.msra.gmra.mrb[0].mxu1 %vm523_vm1, %v2595_v8 }
  0xa2   : > { %1816 = vmatprep.mubr.msk.f32.mxu1 %vm2266_vm0, %v2267_v1 }
 0x174   : > { %v593_v10 = vpop.f32.mrb[0].mxu1 }
 0x175   : > { %v2605_v11 = vadd.f32 %v1735_v9, %v593_v10  ;;  %v1813_v12 = vpop.f32.mrb[1].mxu1  ;;  %v1277_v9 = vld [vmem:[%s2795_s3 + $0x8] sm:$0xff] }
 0x176   : > { %v1902_v10 = vpack.c.bf16 %v1277_v9, %v1276_v7 }
 0x177   : > { %599 = vrot.lane.b32.xlu0 %v2605_v11, %s2268_s19  ;;  %v597_v13 = vmul.f32 0.35355338, %v2605_v11  ;;  %s2840_s19 = sld [smem:[#allocation21_spill]] }
 0x179   : > { %764 = vrot.lane.b32.xlu1 %v597_v13, %s2269_s11  ;;  %s2841_s11 = sld [smem:[#allocation16_spill]] }
 0x17b   : > { %766 = vrot.lane.b32.xlu0 %v2605_v11, %s2270_s22  ;;  %s2279_s22 = smov 8  }
 0x17d   : > { %931 = vrot.lane.b32.xlu1 %v2605_v11, %s2271_s18 }
 0x17f   : > { %929 = vrot.lane.b32.xlu0 %v597_v13, %s2272_s20  ;;  %s2842_s20 = sld [smem:[#allocation22_spill]] }
 0x181   : > { %1096 = vrot.lane.b32.xlu1 %v2605_v11, %s2273_s17 }
 0x183   : > { %1094 = vrot.lane.b32.xlu0 %v597_v13, %s2274_s16 }
 0x1e9   : > { %v600_v14 = vpop.permute.xlu0 %599 }
 0x1ea   : > { %1815 = vmatpush3.xpose.msk.msra.mxu1 %vm601_vm2, %v600_v14 }
 0x1eb   : > { %v765_v15 = vpop.permute.xlu1 %764  ;;  %1819 = vmatprep.subr.mxu1 %v2267_v1 }
 0x1ed   : > { %v767_v16 = vpop.permute.xlu0 %766  ;;  %1817 = vmatmul.mubr.msk.f32.vlgmr.msra.gmra.mrb[2].mxu1 %vm601_vm2, %v597_v13 }
 0x1ee   : > { %1825 = vmatpush3.xpose.msk.msra.mxu0 %vm601_vm2, %v767_v16  ;;  %1821 = vmatprep.mubr.msk.f32.mxu1 %vm2266_vm0, %v2267_v1  ;;  %v1279_v16 = vld [vmem:[%s2795_s3 + $0x18] sm:$0xff] }
 0x1ef   : > { %v932_v17 = vpop.permute.xlu1 %931  ;;  %1834 = vmatprep.subr.mxu0 %v2267_v1 }
 0x1f1   : > { %1827 = vmatmul.mubr.msk.f32.vlgmr.msra.gmra.mrb[0].mxu0 %vm601_vm2, %v765_v15  ;;  %v930_v18 = vpop.permute.xlu0 %929  ;;  %v1278_v15 = vld [vmem:[%s2795_s3 + $0x10] sm:$0xff] }
 0x1f2   : > { %1835 = vmatpush3.xpose.msk.msra.mxu0 %vm601_vm2, %v932_v17  ;;  %1836 = vmatprep.mubr.msk.f32.mxu0 %vm2266_vm0, %v2267_v1  ;;  %v1905_v17 = vpack.c.bf16 %v1279_v16, %v1278_v15 }
 0x1f3   : > { %1844 = vmatprep.subr.mxu0 %v2267_v1  ;;  %v1097_v19 = vpop.permute.xlu1 %1096 }
 0x1f5   : > { %1837 = vmatmul.mubr.msk.f32.vlgmr.msra.gmra.mrb[2].mxu0 %vm601_vm2, %v930_v18  ;;  %v1095_v20 = vpop.permute.xlu0 %1094 }
 0x1f6   : > { %1845 = vmatpush3.xpose.msk.msra.mxu0 %vm601_vm2, %v1097_v19  ;;  %1846 = vmatprep.mubr.msk.f32.mxu0 %vm2266_vm0, %v2267_v1 }
 0x1f7   : > { %1901 = vmatprep.subr.bf16.mxu0 %v2265_v0 }
 0x1f9   : > { %1847 = vmatmul.mubr.msk.f32.vlgmr.msra.gmra.mrb[4].mxu0 %vm601_vm2, %v1095_v20 }
 0x1fa   : > { %1862 = vmatprep.mubr.msk.f32.mxu0 %vm2266_vm0, %v2267_v1  ;;  %1903 = vmatpush3.bf16.msra.mxu0 %v1902_v10 }
 0x1fb   : > { %1904 = vmatprep.subr.bf16.mxu0 %v2265_v0 }
 0x1fe   : > { %1906 = vmatpush3.bf16.msra.mxu0 %v1905_v17 }
 0x1ff   : > { %1913 = vmatprep.subr.bf16.mxu0 %v2265_v0 }
 0x2c0   : > { %v673_v21 = vpop.f32.mrb[2].mxu1 }
 0x2c1   : > { %v1818_v22 = vpop.f32.mrb[3].mxu1  ;;  %v677_v23 = vsel %vm601_vm2, %v673_v21, -inf }
 0x2c2   : > { %678 = vmax.xlane.f32.xlu1 %v677_v23 }
 0x2c4   : > { %v838_v24 = vpop.f32.mrb[0].mxu0 }
 0x2c5   : > { %v1828_v25 = vpop.f32.mrb[1].mxu0  ;;  %v842_v26 = vsel %vm601_vm2, %v838_v24, -inf }
 0x2c6   : > { %843 = vmax.xlane.f32.xlu0 %v842_v26 }
 0x2c8   : > { %v1003_v27 = vpop.f32.mrb[2].mxu0 }
 0x2c9   : > { %v1838_v28 = vpop.f32.mrb[3].mxu0  ;;  %v1007_v29 = vsel %vm601_vm2, %v1003_v27, -inf }
 0x2ca   : > { %1008 = vmax.xlane.f32.xlu0 %v1007_v29  ;;  %v1749_v28 = vld [vmem:[%s2796_s4] ss:$0 sm:$0xff] }
 0x2cc   : > { %v1168_v30 = vpop.f32.mrb[4].mxu0 }
 0x2cd   : > { %v1848_v31 = vpop.f32.mrb[5].mxu0  ;;  %v1172_v32 = vsel %vm601_vm2, %v1168_v30, -inf }
 0x2ce   : > { %1173 = vmax.xlane.f32.xlu1 %v1172_v32 }
 0x2df   : > { %853 = vrot.lane.b32.xlu1 %v2605_v11, %s2275_s9  ;;  %s2280_s9 = smov 16  }
 0x34f   : > { %v679_v33 = vpop.xlane.xlu1 %678 }
 0x350   : > { %v680_v34 = vsub.f32 %v673_v21, %v679_v33 }
 0x352   : > { %v681_v35 = vmul.f32 1.442695, %v680_v34 }
 0x353   : > { %v844_v36 = vpop.xlane.xlu0 %843 }
 0x354   : > { %2035 = vpow2.f32 %v681_v35  ;;  %v845_v37 = vsub.f32 %v838_v24, %v844_v36 }
 0x356   : > { %v846_v38 = vmul.f32 1.442695, %v845_v37 }
 0x357   : > { %v1009_v48 = vpop.xlane.xlu0 %1008 }
 0x358   : > { %2037 = vpow2.f32 %v846_v38  ;;  %v1010_v49 = vsub.f32 %v1003_v27, %v1009_v48 }
 0x35a   : > { %v1011_v50 = vmul.f32 1.442695, %v1010_v49 }
 0x35b   : > { %v1174_v39 = vpop.xlane.xlu1 %1173 }
 0x35c   : > { %v1175_v40 = vsub.f32 %v1168_v30, %v1174_v39  ;;  %v1392_v39 = vld [vmem:[%s2799_s7 + $0x8] sm:$0xff] }
 0x35e   : > { %v2036_v41 = vpop.eup %2035  ;;  %v1176_v42 = vmul.f32 1.442695, %v1175_v40 }
 0x35f   : > { %v683_v43 = vsel %vm601_vm2, %v2036_v41, 0.0  ;;  %v854_v53 = vpop.permute.xlu1 %853 }
 0x360   : > { %2039 = vpow2.f32 %v1176_v42  ;;  %684 = vadd.xlane.f32.xlu0 %v683_v43 }
 0x361   : > { %2041 = vpow2.f32 %v1011_v50 }
 0x362   : > { %v2038_v44 = vpop.eup %2037 }
 0x363   : > { %v848_v45 = vsel %vm601_vm2, %v2038_v44, 0.0 }
 0x364   : > { %849 = vadd.xlane.f32.xlu1 %v848_v45 }
 0x36a   : > { %v2040_v46 = vpop.eup %2039 }
 0x36b   : > { %v1178_v47 = vsel %vm601_vm2, %v2040_v46, 0.0  ;;  %v2042_v51 = vpop.eup %2041 }
 0x36c   : > { %1179 = vadd.xlane.f32.xlu1 %v1178_v47  ;;  %v1013_v52 = vsel %vm601_vm2, %v2042_v51, 0.0 }
 0x376   : > { %688 = vrot.lane.b32.xlu0 %v2605_v11, %s2276_s10  ;;  %s2281_s10 = smov 24  }
 0x37d   : > { %1018 = vrot.lane.b32.xlu1 %v2605_v11, %s2277_s12  ;;  %s1760_s12 = sshll.u32 %s2841_s11, 7 }
 0x37e   : > { %s2742_s1 = scalar_lea.hbm %s2844_s0, %s1760_s12 }
 0x395   : > { %1014 = vadd.xlane.f32.xlu0 %v1013_v52 }
 0x3ab   : > { %1183 = vrot.lane.b32.xlu0 %v2605_v11, %s2278_s13  ;;  %s510_s13 = scalar_lea.vmem [#allocation10], %s1730_s15  ;;  %s2282_s15 = smov [#allocation10]  }
 0x3ac   : > { %s1611_s24 = sshll.u32 %s510_s13, 4  ;;  %s2173_s11 = sshll.u32 %s2282_s15, 4  ;;  %s2744_s24 = int_to_ptr.vmem [resolvable:$true] %s1611_s24  ;;  %s2174_s11 = int_to_ptr.vmem [resolvable:$false] %s2173_s11 }
 0x3ad   : > { %s2169_s18 = scalar_lea.vmem %s2744_s24, 128  ;;  %p2176_p6 = scmp.lt.s32.totalorder %s2744_s24, %s2174_s11 }
 0x3ae   : > { %p2170_p12 = scmp.ne.s32.totalorder %s2744_s24, %s2169_s18 }
 0x3b0   : > { %p2171_p1 = pnand %p2170_p12, %p2503_p2 }
 0x3b2   : > { %p2172_p4 = pneg %p2171_p1 }
 0x3ed   : > { %v685_v54 = vpop.xlane.xlu0 %684 }
 0x3ee   : > { %2043 = vrcp.f32 %v685_v54 }
 0x3f1   : > { %v689_v55 = vpop.permute.xlu0 %688  ;;  %v850_v56 = vpop.xlane.xlu1 %849 }
 0x3f2   : > { %2045 = vrcp.f32 %v850_v56  ;;  %1820 = vmatpush3.msra.mxu1 %v689_v55  ;;  %v1751_v56 = vld [vmem:[#allocation5] ss:$0 sm:$0xff] }
 0x3f3   : > { %1829 = vmatprep.subr.mxu1 %v2267_v1 }
 0x3f8   : > { %v2044_v57 = vpop.eup %2043 }
 0x3f9   : > { %v687_v58 = vmul.f32 %v2044_v57, %v2036_v41  ;;  %v1180_v59 = vpop.xlane.xlu1 %1179  ;;  %v1394_v41 = vld [vmem:[%s2799_s7 + $0x18] sm:$0xff] }
 0x3fb   : > { %1822 = vmatmul.mubr.msk.f32.vlgmr.msra.gmra.mrb[4].mxu1 %vm601_vm2, %v687_v58  ;;  %v1752_v58 = vld [vmem:[#allocation7] ss:$0 sm:$0xff] }
 0x3fc   : > { %v2046_v60 = vpop.eup %2045  ;;  %1830 = vmatpush3.msra.mxu1 %v854_v53  ;;  %1831 = vmatprep.mubr.msk.f32.mxu1 %vm2266_vm0, %v2267_v1 }
 0x3fd   : > { %v852_v61 = vmul.f32 %v2046_v60, %v2038_v44  ;;  %v1019_v62 = vpop.permute.xlu1 %1018  ;;  %1839 = vmatprep.subr.mxu1 %v2267_v1 }
 0x3ff   : > { %1832 = vmatmul.mubr.msk.f32.vlgmr.msra.gmra.mrb[6].mxu1 %vm601_vm2, %v852_v61 }
 0x400   : > { %1840 = vmatpush3.msra.mxu1 %v1019_v62  ;;  %1841 = vmatprep.mubr.msk.f32.mxu1 %vm2266_vm0, %v2267_v1 }
 0x401   : > { %1849 = vmatprep.subr.mxu1 %v2267_v1 }
 0x422   : > { %v1015_v63 = vpop.xlane.xlu0 %1014 }
 0x423   : > { %2047 = vrcp.f32 %v1015_v63  ;;  %v1753_v63 = vld [vmem:[#allocation8] ss:$0 sm:$0xff] }
 0x424   : > { %2049 = vrcp.f32 %v1180_v59 }
 0x426   : > { %v1184_v5 = vpop.permute.xlu0 %1183 }
 0x42d   : > { %v2048_v2 = vpop.eup %2047 }
 0x42e   : > { %v1017_v3 = vmul.f32 %v2048_v2, %v2042_v51  ;;  %v2050_v4 = vpop.eup %2049 }
 0x42f   : > { %v1182_v6 = vmul.f32 %v2050_v4, %v2040_v46 }
 0x430   : > { %1842 = vmatmul.mubr.msk.f32.vlgmr.msra.gmra.mrb[8].mxu1 %vm601_vm2, %v1017_v3 }
 0x431   : > { %1850 = vmatpush3.msra.mxu1 %v1184_v5  ;;  %1851 = vmatprep.mubr.msk.f32.mxu1 %vm2266_vm0, %v2267_v1 }
 0x432   : > { %1907 = vmatprep.subr.bf16.mxu1 %v2265_v0 }
 0x434   : > { %1852 = vmatmul.mubr.msk.f32.vlgmr.msra.gmra.mrb[10].mxu1 %vm601_vm2, %v1182_v6  ;;  %v1755_v6 = vld [vmem:[%s2840_s19] ss:$0 sm:$0xff] }
 0x435   : > { %1873 = vmatprep.mubr.msk.f32.mxu1 %vm2266_vm0, %v2267_v1 }
 0x4ce   : > { %v760_v11 = vpop.f32.mrb[4].mxu1 }
 0x4cf   : > { %v1823_v12 = vpop.f32.mrb[5].mxu1 }
 0x4d2   : > { %v925_v13 = vpop.f32.mrb[6].mxu1 }
 0x4d3   : > { %1260 = vrot.lane.b32.xlu1 %v925_v13, %s2279_s22  ;;  %v1833_v14 = vpop.f32.mrb[7].mxu1  ;;  %s1597_s22 = scalar_lea.sflag [#allocation4], %s2558_s23 }
 0x503   : > { %v1090_v18 = vpop.f32.mrb[8].mxu1 }
 0x504   : > { %1264 = vrot.lane.b32.xlu0 %v1090_v18, %s2280_s9  ;;  %v1843_v19 = vpop.f32.mrb[9].mxu1  ;;  %s2843_s9 = sld [smem:[#allocation23_spill]] }
 0x507   : > { %v1255_v20 = vpop.f32.mrb[10].mxu1 }
 0x508   : > { %1268 = vrot.lane.b32.xlu1 %v1255_v20, %s2281_s10  ;;  %v1853_v21 = vpop.f32.mrb[11].mxu1  ;;  %s2839_s10 = sld [smem:[#allocation20_spill]] }
 0x50e   : > { %v1476_v43 = vld [vmem:[%s2839_s10] sm:$0xff]  ;;  %v1477_v44 = vld [vmem:[%s2839_s10 + $0x8] sm:$0xff]  ;;  %v1478_v45 = vld [vmem:[%s2839_s10 + $0x10] sm:$0xff] }
 0x50f   : > { %v1914_v46 = vpack.c.bf16 %v1477_v44, %v1476_v43  ;;  %v1479_v47 = vld [vmem:[%s2839_s10 + $0x18] sm:$0xff]  ;;  %v1480_v49 = vld [vmem:[%s2839_s10 + $0x20] sm:$0xff]  ;;  %v1481_v50 = vld [vmem:[%s2839_s10 + $0x28] sm:$0xff] }
 0x510   : > { %v1917_v48 = vpack.c.bf16 %v1479_v47, %v1478_v45  ;;  %v1920_v51 = vpack.c.bf16 %v1481_v50, %v1480_v49  ;;  %v1482_v61 = vld [vmem:[%s2839_s10 + $0x30] sm:$0xff] }
 0x545   : > { %v1261_v22 = vpop.permute.xlu1 %1260 }
 0x546   : > { %v1271_v24 = vsel %vm601_vm2, %v760_v11, %v1261_v22  ;;  %v1757_v22 = vld [vmem:[%s2842_s20] ss:$0 sm:$0xff]  ;;  %s2175_s20 = scalar_lea.vmem %s2174_s11, 256 }
 0x547   : > { %p2177_p8 = scmp.lt.s32.totalorder %s2175_s20, %s2169_s18 }
 0x549   : > { %p2178_p0 = por %p2177_p8, %p2176_p6 }
 0x54b   : > { %p2179_p5 = pnand %p2178_p0, %p2172_p4 }
 0x576   : > { %v1265_v23 = vpop.permute.xlu0 %1264 }
 0x577   : > { %v1273_v25 = vsel %vm1272_vm3, %v1271_v24, %v1265_v23  ;;  %v1758_v24 = vld [vmem:[%s2843_s9] ss:$0 sm:$0xff] }
 0x57a   : > { %v1269_v26 = vpop.permute.xlu1 %1268 }
 0x57b   : > { %v1275_v27 = vsel %vm1274_vm4, %v1273_v25, %v1269_v26 }
 0x57c   : > { %1863 = vmatmul.mubr.msk.f32.vlgmr.msra.gmra.mrb[6].mxu0 %vm523_vm1, %v1275_v27 }
 0x57d   : > { %1892 = vmatprep.mubr.msk.f32.mxu0 %vm2266_vm0, %v2267_v1  ;;  %v1391_v1 = vld [vmem:[%s2799_s7] sm:$0xff]  ;;  %1915 = vmatpush3.bf16.msra.mxu0 %v1914_v46 }
 0x57e   : > { %v1908_v40 = vpack.c.bf16 %v1392_v39, %v1391_v1  ;;  %1916 = vmatprep.subr.bf16.mxu0 %v2265_v0 }
 0x580   : > { %1909 = vmatpush3.bf16.msra.mxu1 %v1908_v40 }
 0x581   : > { %1910 = vmatprep.subr.bf16.mxu1 %v2265_v0  ;;  %1918 = vmatpush3.bf16.msra.mxu0 %v1917_v48 }
 0x582   : > { %1919 = vmatprep.subr.bf16.mxu0 %v2265_v0 }
 0x585   : > { %1921 = vmatpush3.bf16.msra.mxu0 %v1920_v51 }
 0x586   : > { %1922 = vmatprep.subr.bf16.mxu0 %v2265_v0  ;;  %v1483_v0 = vld [vmem:[%s2839_s10 + $0x38] sm:$0xff] }
 0x587   : > { %v1923_v62 = vpack.c.bf16 %v1483_v0, %v1482_v61 }
 0x589   : > { %1924 = vmatpush3.bf16.msra.mxu0 %v1923_v62 }
 0x64f   : > { %v1356_v29 = vpop.f32.mrb[6].mxu0 }
 0x650   : > { %v1357_v30 = vadd.f32 %v1749_v28, %v1356_v29  ;;  %v1864_v31 = vpop.f32.mrb[7].mxu0 }
 0x652   : > { %v1360_v32 = vadd.f32 %v1357_v30, %v2595_v8  ;;  %v1393_v8 = vld [vmem:[%s2799_s7 + $0x10] sm:$0xff] }
 0x653   : > { %v1911_v42 = vpack.c.bf16 %v1394_v41, %v1393_v8 }
 0x654   : > { %v1363_v33 = vsel %vm523_vm1, %v1360_v32, 0.0 }
 0x655   : > { %1364 = vadd.xlane.f32.xlu0 %v1363_v33  ;;  %1912 = vmatpush3.bf16.msra.mxu1 %v1911_v42 }
 0x6e2   : > { %v1365_v34 = vpop.xlane.xlu0 %1364 }
 0x6e3   : > { %v1367_v35 = vmul.f32 0.03125, %v1365_v34 }
 0x6e5   : > { %v1368_v36 = vsub.f32 %v1360_v32, %v1367_v35 }
 0x6e7   : > { %v1369_v37 = vmul.f32 %v1368_v36, %v1368_v36 }
 0x6e9   : > { %v1370_v38 = vsel %vm523_vm1, %v1369_v37, 0.0 }
 0x6ea   : > { %1371 = vadd.xlane.f32.xlu1 %v1370_v38 }
 0x777   : > { %v1372_v52 = vpop.xlane.xlu1 %1371 }
 0x778   : > { %v1373_v53 = vmul.f32 0.03125, %v1372_v52 }
 0x77a   : > { %v1374_v54 = vadd.f32 1e-05, %v1373_v53 }
 0x77c   : > { %2051 = vrsqrt.f32 %v1374_v54 }
 0x786   : > { %v2052_v55 = vpop.eup %2051 }
 0x787   : > { %v1376_v57 = vmul.f32 %v2052_v55, %v1368_v36 }
 0x789   : > { %v1383_v59 = vmul.f32 %v1751_v56, %v1376_v57 }
 0x78b   : > { %v1390_v60 = vadd.f32 %v1752_v58, %v1383_v59 }
 0x78d   : > { %1874 = vmatmul.mubr.msk.f32.vlgmr.msra.gmra.mrb[12].mxu1 %vm523_vm1, %v1390_v60 }
 0x860   : > { %v1471_v2 = vpop.f32.mrb[12].mxu1 }
 0x861   : > { %v1472_v3 = vadd.f32 %v1753_v63, %v1471_v2  ;;  %v1875_v4 = vpop.f32.mrb[13].mxu1 }
 0x863   : > { %v1475_v5 = vmax.f32 %v1472_v3, 0.0 }
 0x865   : > { %1893 = vmatmul.mubr.msk.f32.vlgmr.msra.gmra.mrb[8].mxu0 %vm1491_vm5, %v1475_v5 }
 0x938   : > { %v1561_v7 = vpop.f32.mrb[8].mxu0 }
 0x939   : > { %v1562_v9 = vadd.f32 %v1755_v6, %v1561_v7  ;;  %v1894_v10 = vpop.f32.mrb[9].mxu0 }
 0x93b   : > { %v1565_v11 = vadd.f32 %v1562_v9, %v1390_v60 }
 0x93d   : > { %v1568_v12 = vsel %vm523_vm1, %v1565_v11, 0.0 }
 0x93e   : > { %1569 = vadd.xlane.f32.xlu0 %v1568_v12 }
 0x9cb   : > { %v1570_v13 = vpop.xlane.xlu0 %1569 }
 0x9cc   : > { %v1571_v14 = vmul.f32 0.03125, %v1570_v13 }
 0x9ce   : > { %v1572_v15 = vsub.f32 %v1565_v11, %v1571_v14 }
 0x9d0   : > { %v1573_v16 = vmul.f32 %v1572_v15, %v1572_v15 }
 0x9d2   : > { %v1574_v17 = vsel %vm523_vm1, %v1573_v16, 0.0 }
 0x9d3   : > { %1575 = vadd.xlane.f32.xlu0 %v1574_v17 }
 0xa60   : > { %v1576_v18 = vpop.xlane.xlu0 %1575 }
 0xa61   : > { %v1577_v19 = vmul.f32 0.03125, %v1576_v18 }
 0xa63   : > { %v1578_v20 = vadd.f32 1e-05, %v1577_v19 }
 0xa65   : > { %2053 = vrsqrt.f32 %v1578_v20 }
 0xa6f   : > { %v2054_v21 = vpop.eup %2053 }
 0xa70   : > { %v1580_v23 = vmul.f32 %v2054_v21, %v1572_v15 }
 0xa72   : > { %v1587_v25 = vmul.f32 %v1757_v22, %v1580_v23 }
 0xa74   : > { %v1594_v26 = vadd.f32 %v1758_v24, %v1587_v25 }
 0xa76   : > { %1595 = vst.msk [vmem:[%s510_s13] sm:$0xff] %vm523_vm1, %v1594_v26 }
 0xa77   : > { %2182 = shalt.err (!%p2179_p5)
}
 0xa78   : > { %s2183_s23 = scalar_lea.hbm %s2742_s1, 128  ;;  %s2187_s9 = scalar_lea.hbm %s2844_s0, 256 }
 0xa79   : > { %p2184_p10 = scmp.ne.s32.totalorder %s2742_s1, %s2183_s23  ;;  %p2188_p7 = scmp.lt.u32.totalorder %s2742_s1, %s2844_s0 }
 0xa7a   : > { %p2189_p3 = scmp.lt.u32.totalorder %s2187_s9, %s2183_s23  ;;  %p2191_p12 = scmp.lt.u32.totalorder %s2183_s23, %s2742_s1 }
 0xa7b   : > { %p2185_p13 = pnand %p2184_p10, %p2503_p2 }
 0xa7c   : > { %p2190_p11 = por %p2189_p3, %p2188_p7 }
 0xa7d   : > { %p2186_p9 = pneg %p2185_p13 }
 0xa7e   : > { %p2192_p1 = por %p2191_p12, %p2190_p11 }
 0xa80   : > { %p2193_p4 = pnand %p2192_p1, %p2186_p9 }
 0xa82   : > { %2196 = shalt.err (!%p2193_p4)
}
 0xa83   : > { %1939 = dma.vmem_to_hbm [thread:$0]  (%p2503_p2), %s2744_s24, 128, %s2742_s1, %s1597_s22  }
 0xa84 PF: > { %s2845_s28 = sld [smem:[#allocation15_spill]]  ;;  %s2846_s19 = sld [smem:[#allocation17_spill]] }
 0xa85   : > { %p2848_p8 = scmp.ge.s32.totalorder %s2259_s30, 2 }
 0xa8a   : > { %s1623_s18 = sand.u32 1, %s2845_s28   ;;  %p2847_p6 = scmp.ne.s32.totalorder %s2846_s19, 0 }
 0xa8b   : > { %s1624_s15 = scalar_lea.sflag [#allocation4], %s1623_s18 }
 0xa8c   : > { %p1956_p0 = pnand %p2848_p8, %p2847_p6 }
 0xa8e   : > { %2234 = dma.done.wait (!%p1956_p0), %s1624_s15, 128  }
 0xa8f   : > { %2236 = vsyncadd (!%p1956_p0), %s1624_s15, 4294967168  ;;  %s31_s30 = sadd.s32 1, %s2259_s30   ;;  %s2849_s14 = smov %s2515_s25 }
 0xa90   : > { %p28_p5 = scmp.ge.s32.totalorder %s31_s30, 4   ;;  %s2850_s25 = smov %s2243_s26 }
 0xa91   : > { %s2851_s26 = smov %s2247_s27  ;;  %s2852_s27 = smov %s2849_s14 }
 0xa92   : > { %s2853_s28 = smov %s2255_s29  ;;  %s2854_s29 = smov %s2856_s21 }
 0xa93   :  { %30 = sbr.rel (!%p28_p5) target bundleno = 16 (0x10), region = 129 }
 0xa9a   :  { %1629 = vsyncpa [#allocation3], 1 }
 0xa9b   :  { %1631 = vsyncpa [#allocation3 + $0x1], 1 }
 0xa9c   :  { %1632 = vsyncpa [#allocation6], 1 }
 0xa9d   :  { %1633 = vsyncpa [#allocation9], 1 }
 0xa9e   :  { %1634 = vsyncpa [#allocation4], 1 }
 0xa9f   :  { %1636 = vsyncpa [#allocation4 + $0x1], 1 }

</bundles_post_ra>
